<compile_context>
chip_gen: v7x
topology: tpu7x:2x2x1
jax: 0.10.0
libtpu: 0.0.40
codegen_flags: <defaults>
</compile_context>

<pallas_src>
import functools

import numpy as np
import jax
import jax.numpy as jnp
from jax import lax
from jax.experimental import pallas as pl
from jax.experimental.pallas import tpu as pltpu


# -----------------------------------------------------------------------------
# Pallas kernel.  One grid step == Nb batch elements (M = Nb*I point columns).
# All tensors are channel-major: (features, points) with points on the lanes.
# -----------------------------------------------------------------------------
def conv_kernel(x_ref, lbl_ref, wbig_ref, wm_ref, bm_ref, b_ref, out_ref, *,
                clusters_per_block):
    G = clusters_per_block                      # Nb * K classes inside this block
    x = x_ref[...]                              # (C, M)  channel-major points
    C, M = x.shape
    CP = out_ref.shape[0]                       # C + P

    # --- cluster-mean aggregation via one-hot labels (no dense (I,I) mask) ---
    # labels are global (b*K + label); localize them to [0, G) for this block.
    cls = lbl_ref[...] - pl.program_id(0) * G                              # (1, M) int32
    onehot = (cls == lax.broadcasted_iota(jnp.int32, (G, M), 0)
              ).astype(jnp.float32)                                        # (G, M)
    ones_row = jnp.ones((1, M), jnp.float32)
    x_aug = jnp.concatenate([x, ones_row], axis=0)                         # (C+1, M)
    # per-class sums and counts in a single MXU contraction over the M lanes
    sums_aug = lax.dot_general(x_aug, onehot, (((1,), (1,)), ((), ())),
                               preferred_element_type=jnp.float32)         # (C+1, G)
    counts = jnp.maximum(sums_aug[C:C + 1, :], 1.0)                        # (1, G)
    centroid = sums_aug[:C, :] * (1.0 / counts)     # divide folded here: G values, not M
    mu = jnp.dot(centroid, onehot, preferred_element_type=jnp.float32)     # (C, M)
    diff = mu - x                                   # mean_j (x_j - x_i), per point

    # --- fused message + transform bilinear matmul -------------------------
    # G_cat rows = [diff ⊗ x  (C*C) ; x (C) ; x ⊗ x (C*C) ; x (C)]
    # Wbig is block-diagonal so one MXU push yields both aggr and transf.
    def outer_rows(a):                              # row k*C+c = a[k, :] * x[c, :]
        return jnp.concatenate([a[k:k + 1, :] * x for k in range(C)], axis=0)

    g_cat = jnp.concatenate([outer_rows(diff), x, outer_rows(x), x], axis=0)  # (2*(C*C+C), M)
    res = jnp.dot(wbig_ref[...], g_cat, preferred_element_type=jnp.float32)   # (2*CP, M)
    aggr = res[:CP, :]                              # mean-aggregated messages  (CP, M)
    transf = res[CP:, :]                            # W-path transformation     (CP, M)

    # --- update: Weight = M(aggr) on the VPU (no width-1 MXU matmul) --------
    weight = jnp.sum(aggr * wm_ref[...], axis=0, keepdims=True) + bm_ref[...]  # (1, M)

    # lane-dense store: out block is (CP, Nb*I), last dim a multiple of 128
    out_ref[...] = jax.nn.sigmoid(aggr * weight + transf + b_ref[...])


def kmeans_conv_pallas(x_t, labels_row, params, *, k, batches_per_block,
                       points_per_batch):
    C, n_points = x_t.shape
    cp = params["B_col"].shape[0]
    m = batches_per_block * points_per_batch
    assert n_points % m == 0
    grid = (n_points // m,)

    kern = functools.partial(conv_kernel,
                             clusters_per_block=batches_per_block * k)

    def rep(shape):           # replicated (tiny) operand: constant block index
        return pl.BlockSpec(shape, lambda n: (0, 0))

    return pl.pallas_call(
        kern,
        out_shape=jax.ShapeDtypeStruct((cp, n_points), jnp.float32),
        grid_spec=pltpu.PrefetchScalarGridSpec(
            num_scalar_prefetch=0,
            grid=grid,
            in_specs=[
                pl.BlockSpec((C, m), lambda n: (0, n)),   # points, channel-major
                pl.BlockSpec((1, m), lambda n: (0, n)),   # global cluster ids (int32)
                rep(params["Wbig"].shape),                # fused bilinear weights
                rep((cp, 1)),                             # wM (column)
                rep((1, 1)),                              # bM
                rep((cp, 1)),                             # B  (column)
            ],
            out_specs=pl.BlockSpec((cp, m), lambda n: (0, n)),
        ),
        compiler_params=pltpu.CompilerParams(
            dimension_semantics=("parallel",)),           # batch axis -> both v7x TCs
    )(x_t, labels_row, params["Wbig"], params["wM_col"], params["bM"],
      params["B_col"])


# -----------------------------------------------------------------------------
# Host glue: deterministic parameter init, k-means clustering, layout plumbing.
# -----------------------------------------------------------------------------
def init_params(key, C, P):
    CP = C + P
    Q = CP * C
    ks = jax.random.split(key, 7)
    wF = 0.1 * jax.random.normal(ks[0], (Q, C), jnp.float32)   # Linear(C -> Q)
    bF = 0.1 * jax.random.normal(ks[1], (Q,), jnp.float32)
    wW = 0.1 * jax.random.normal(ks[2], (Q, C), jnp.float32)
    bW = 0.1 * jax.random.normal(ks[3], (Q,), jnp.float32)
    wM = 0.1 * jax.random.normal(ks[4], (1, CP), jnp.float32)  # Linear(C+P -> 1)
    bM = 0.1 * jax.random.normal(ks[5], (1,), jnp.float32)
    B = jax.random.normal(ks[6], (CP,), jnp.float32)           # self.B = randn(C+P)

    # Kernel-side re-layout (host precompute, done once):
    #   WF_mat[p, k*C+c] = wF[p*C+c, k]  folds Linear + .view(CP, C) + bmm +
    #   segment-sum into a single bilinear matmul against [diff ⊗ x ; x].
    WF_mat = np.asarray(wF).reshape(CP, C, C).transpose(0, 2, 1).reshape(CP, C * C)
    WW_mat = np.asarray(wW).reshape(CP, C, C).transpose(0, 2, 1).reshape(CP, C * C)
    bF_mat = np.asarray(bF).reshape(CP, C)
    bW_mat = np.asarray(bW).reshape(CP, C)
    seg = C * C + C
    Wbig = np.zeros((2 * CP, 2 * seg), np.float32)     # block-diag: F-path | W-path
    Wbig[:CP, :C * C] = WF_mat
    Wbig[:CP, C * C:seg] = bF_mat
    Wbig[CP:, seg:seg + C * C] = WW_mat
    Wbig[CP:, seg + C * C:] = bW_mat

    return dict(
        # reference (PyTorch-Linear) form, used only by the pure-JAX check
        wF2=wF.T, bF2=bF.reshape(1, Q), wW2=wW.T, bW2=bW.reshape(1, Q),
        wM2=wM.T, bM2=bM.reshape(1, 1), B2=B.reshape(1, CP),
        # kernel form
        Wbig=jnp.asarray(Wbig),
        wM_col=wM.T.reshape(CP, 1),
        bM=bM.reshape(1, 1),
        B_col=B.reshape(CP, 1),
    )


def simple_kmeans(points, k, iters=10):
    # Deterministic Lloyd's algorithm (host-side glue; see TODO in header).
    pts = np.asarray(points, np.float64)
    centroids = pts[:k].copy()
    labels = np.zeros(pts.shape[0], np.int64)
    for _ in range(iters):
        d = ((pts[:, None, :] - centroids[None, :, :]) ** 2).sum(-1)
        labels = d.argmin(axis=1)
        for c in range(k):
            m = labels == c
            if m.any():
                centroids[c] = pts[m].mean(axis=0)
    return labels


def kmeans_conv_forward(feature_matrix_batch, k, params, *, batches_per_block=1):
    N, I, C = feature_matrix_batch.shape
    assert N % batches_per_block == 0
    xn = np.asarray(feature_matrix_batch)
    local = np.stack([simple_kmeans(xn[b], k) for b in range(N)])        # (N, I)
    clusters = local + np.arange(N)[:, None] * k                         # global ids, as in the torch code
    # layout plumbing (outside the kernel): channel-major points, flat labels
    x_t = jnp.transpose(feature_matrix_batch, (2, 0, 1)).reshape(C, N * I)
    labels_row = jnp.asarray(clusters.reshape(1, N * I), dtype=jnp.int32)
    out_flat = kmeans_conv_pallas(x_t, labels_row, params, k=k,
                                  batches_per_block=batches_per_block,
                                  points_per_batch=I)
    conv_out = out_flat.T.reshape(N, I, -1)
    return (feature_matrix_batch, conv_out,
            jnp.asarray(clusters.reshape(-1), jnp.int32))


# -----------------------------------------------------------------------------
# Pure-JAX reference of the Conv math (independent formulation, for checking).
# -----------------------------------------------------------------------------
def conv_reference(x, mask, params, C, P):
    N, I, _ = x.shape
    CP = C + P
    cnt = mask.sum(-1, keepdims=True)
    mu = jnp.einsum("nij,njc->nic", mask, x) / cnt
    diff = mu - x
    Fo = (diff @ params["wF2"] + params["bF2"]).reshape(N, I, CP, C)
    aggr = jnp.einsum("nipc,nic->nip", Fo, x)
    Weight = aggr @ params["wM2"] + params["bM2"]
    Wo = (x @ params["wW2"] + params["bW2"]).reshape(N, I, CP, C)
    transf = jnp.einsum("nipc,nic->nip", Wo, x)
    return jax.nn.sigmoid(aggr * Weight + transf + params["B2"])


if __name__ == "__main__":
    # Small but TPU-friendly demo shapes: M = NB*I = 128 point-lanes per block,
    # grid = N // NB = 2 steps (keeps both v7x TensorCores busy).
    N, I, C, P, K = 4, 64, 4, 4, 4
    NB = 2
    key = jax.random.PRNGKey(0)
    kx, kp = jax.random.split(key)
    x = jax.random.normal(kx, (N, I, C), jnp.float32)
    params = init_params(kp, C, P)

    fmb, conv_out, clusters = kmeans_conv_forward(x, K, params,
                                                  batches_per_block=NB)
    conv_out = jax.block_until_ready(conv_out)

    assert conv_out.shape == (N, I, C + P)
    assert clusters.shape == (N * I,)

    out_np = np.asarray(conv_out)
    if np.all(np.isfinite(out_np)):
        # Numerical self-check against an independent pure-JAX formulation.
        # (Skipped when the interpret harness runs with float ops disabled,
        #  which yields all-NaN kernel output by construction.)
        labels = np.asarray(clusters).reshape(N, I)
        mask = jnp.asarray((labels[:, :, None] == labels[:, None, :])
                           .astype(np.float32))
        with jax.default_matmul_precision("float32"):
            ref = conv_reference(x, mask, params, C, P)
        np.testing.assert_allclose(out_np, np.asarray(ref),
                                   rtol=2e-3, atol=2e-3)
    print("KERNEL_OK")
</pallas_src>

<mosaic_0001>
module attributes {stable_mosaic.version = 11 : i64} {
  func.func @conv_kernel(%arg0: i32, %arg1: memref<4x128xf32, #tpu.memory_space<vmem>>, %arg2: memref<1x128xi32, #tpu.memory_space<vmem>>, %arg3: memref<16x40xf32, #tpu.memory_space<vmem>>, %arg4: memref<8x1xf32, #tpu.memory_space<vmem>>, %arg5: memref<1x1xf32, #tpu.memory_space<vmem>>, %arg6: memref<8x1xf32, #tpu.memory_space<vmem>>, %arg7: memref<8x128xf32, #tpu.memory_space<vmem>>) attributes {dimension_semantics = [#tpu.dimension_semantics<parallel>], iteration_bounds = array<i64: 2>, scalar_prefetch = 0 : i64, scratch_operands = 0 : i64, tpu.core_type = #tpu.core_type<tc>, window_params = [{transform_indices = @transform_0, window_bounds = array<i64: 4, 128>}, {transform_indices = @transform_1, window_bounds = array<i64: 1, 128>}, {pipeline_mode = #tpu.pipeline_mode<synchronous>, transform_indices = @transform_2, window_bounds = array<i64: 16, 40>}, {pipeline_mode = #tpu.pipeline_mode<synchronous>, transform_indices = @transform_3, window_bounds = array<i64: 8, 1>}, {pipeline_mode = #tpu.pipeline_mode<synchronous>, transform_indices = @transform_4, window_bounds = array<i64: 1, 1>}, {pipeline_mode = #tpu.pipeline_mode<synchronous>, transform_indices = @transform_5, window_bounds = array<i64: 8, 1>}, {transform_indices = @transform_6, window_bounds = array<i64: 8, 128>}]} {
    %c0 = arith.constant 0 : index
    %c0_0 = arith.constant 0 : index
    %0 = vector.load %arg1[%c0, %c0_0] : memref<4x128xf32, #tpu.memory_space<vmem>>, vector<4x128xf32>
    %c0_1 = arith.constant 0 : index
    %c0_2 = arith.constant 0 : index
    %1 = vector.load %arg2[%c0_1, %c0_2] : memref<1x128xi32, #tpu.memory_space<vmem>>, vector<1x128xi32>
    %c8_i32 = arith.constant 8 : i32
    %2 = arith.muli %arg0, %c8_i32 : i32
    %3 = vector.broadcast %2 : i32 to vector<1x128xi32>
    %4 = arith.subi %1, %3 : vector<1x128xi32>
    %5 = tpu.iota {dimensions = array<i32: 0>} : vector<8x128xi32>
    %6 = vector.broadcast %4 : vector<1x128xi32> to vector<8x128xi32>
    %7 = arith.cmpi eq, %6, %5 : vector<8x128xi32>
    %8 = arith.extui %7 : vector<8x128xi1> to vector<8x128xi32>
    %9 = arith.sitofp %8 : vector<8x128xi32> to vector<8x128xf32>
    %cst = arith.constant 1.000000e+00 : f32
    %10 = vector.broadcast %cst : f32 to vector<1x128xf32>
    %11 = tpu.concatenate %0, %10 in 0 : vector<4x128xf32>, vector<1x128xf32> -> vector<5x128xf32>
    %cst_3 = arith.constant dense<0.000000e+00> : vector<5x8xf32>
    %12 = tpu.matmul %11, %9, %cst_3 {dimension_numbers = #tpu.dot_dimension_numbers<[1], [1], [0], [0], [0, 0, 1, 0], [], []>} : vector<5x128xf32>, vector<8x128xf32>, vector<5x8xf32> -> vector<5x8xf32>
    %13 = vector.extract_strided_slice %12 {offsets = [4, 0], sizes = [1, 8], strides = [1, 1]} : vector<5x8xf32> to vector<1x8xf32>
    %cst_4 = arith.constant 1.000000e+00 : f32
    %14 = vector.broadcast %cst_4 : f32 to vector<1x8xf32>
    %15 = arith.maximumf %13, %14 : vector<1x8xf32>
    %16 = vector.extract_strided_slice %12 {offsets = [0, 0], sizes = [4, 8], strides = [1, 1]} : vector<5x8xf32> to vector<4x8xf32>
    %cst_5 = arith.constant 1.000000e+00 : f32
    %17 = vector.broadcast %cst_5 : f32 to vector<1x8xf32>
    %18 = arith.divf %17, %15 : vector<1x8xf32>
    %19 = vector.broadcast %18 : vector<1x8xf32> to vector<4x8xf32>
    %20 = arith.mulf %16, %19 : vector<4x8xf32>
    %cst_6 = arith.constant dense<0.000000e+00> : vector<4x128xf32>
    %21 = tpu.matmul %20, %9, %cst_6 {dimension_numbers = #tpu.dot_dimension_numbers<[1], [0], [0], [1], [0, 0, 1, 1], [], []>} : vector<4x8xf32>, vector<8x128xf32>, vector<4x128xf32> -> vector<4x128xf32>
    %22 = arith.subf %21, %0 : vector<4x128xf32>
    %23 = vector.extract_strided_slice %22 {offsets = [0, 0], sizes = [1, 128], strides = [1, 1]} : vector<4x128xf32> to vector<1x128xf32>
    %24 = vector.broadcast %23 : vector<1x128xf32> to vector<4x128xf32>
    %25 = arith.mulf %24, %0 : vector<4x128xf32>
    %26 = vector.extract_strided_slice %22 {offsets = [1, 0], sizes = [1, 128], strides = [1, 1]} : vector<4x128xf32> to vector<1x128xf32>
    %27 = vector.broadcast %26 : vector<1x128xf32> to vector<4x128xf32>
    %28 = arith.mulf %27, %0 : vector<4x128xf32>
    %29 = vector.extract_strided_slice %22 {offsets = [2, 0], sizes = [1, 128], strides = [1, 1]} : vector<4x128xf32> to vector<1x128xf32>
    %30 = vector.broadcast %29 : vector<1x128xf32> to vector<4x128xf32>
    %31 = arith.mulf %30, %0 : vector<4x128xf32>
    %32 = vector.extract_strided_slice %22 {offsets = [3, 0], sizes = [1, 128], strides = [1, 1]} : vector<4x128xf32> to vector<1x128xf32>
    %33 = vector.broadcast %32 : vector<1x128xf32> to vector<4x128xf32>
    %34 = arith.mulf %33, %0 : vector<4x128xf32>
    %35 = tpu.concatenate %25, %28, %31, %34 in 0 : vector<4x128xf32>, vector<4x128xf32>, vector<4x128xf32>, vector<4x128xf32> -> vector<16x128xf32>
    %36 = vector.extract_strided_slice %0 {offsets = [0, 0], sizes = [1, 128], strides = [1, 1]} : vector<4x128xf32> to vector<1x128xf32>
    %37 = vector.broadcast %36 : vector<1x128xf32> to vector<4x128xf32>
    %38 = arith.mulf %37, %0 : vector<4x128xf32>
    %39 = vector.extract_strided_slice %0 {offsets = [1, 0], sizes = [1, 128], strides = [1, 1]} : vector<4x128xf32> to vector<1x128xf32>
    %40 = vector.broadcast %39 : vector<1x128xf32> to vector<4x128xf32>
    %41 = arith.mulf %40, %0 : vector<4x128xf32>
    %42 = vector.extract_strided_slice %0 {offsets = [2, 0], sizes = [1, 128], strides = [1, 1]} : vector<4x128xf32> to vector<1x128xf32>
    %43 = vector.broadcast %42 : vector<1x128xf32> to vector<4x128xf32>
    %44 = arith.mulf %43, %0 : vector<4x128xf32>
    %45 = vector.extract_strided_slice %0 {offsets = [3, 0], sizes = [1, 128], strides = [1, 1]} : vector<4x128xf32> to vector<1x128xf32>
    %46 = vector.broadcast %45 : vector<1x128xf32> to vector<4x128xf32>
    %47 = arith.mulf %46, %0 : vector<4x128xf32>
    %48 = tpu.concatenate %38, %41, %44, %47 in 0 : vector<4x128xf32>, vector<4x128xf32>, vector<4x128xf32>, vector<4x128xf32> -> vector<16x128xf32>
    %49 = tpu.concatenate %35, %0, %48, %0 in 0 : vector<16x128xf32>, vector<4x128xf32>, vector<16x128xf32>, vector<4x128xf32> -> vector<40x128xf32>
    %c0_7 = arith.constant 0 : index
    %c0_8 = arith.constant 0 : index
    %50 = vector.load %arg3[%c0_7, %c0_8] : memref<16x40xf32, #tpu.memory_space<vmem>>, vector<16x40xf32>
    %cst_9 = arith.constant dense<0.000000e+00> : vector<16x128xf32>
    %51 = tpu.matmul %50, %49, %cst_9 {dimension_numbers = #tpu.dot_dimension_numbers<[1], [0], [0], [1], [0, 0, 1, 1], [], []>} : vector<16x40xf32>, vector<40x128xf32>, vector<16x128xf32> -> vector<16x128xf32>
    %52 = vector.extract_strided_slice %51 {offsets = [0, 0], sizes = [8, 128], strides = [1, 1]} : vector<16x128xf32> to vector<8x128xf32>
    %53 = vector.extract_strided_slice %51 {offsets = [8, 0], sizes = [8, 128], strides = [1, 1]} : vector<16x128xf32> to vector<8x128xf32>
    %c0_10 = arith.constant 0 : index
    %c0_11 = arith.constant 0 : index
    %54 = vector.load %arg4[%c0_10, %c0_11] : memref<8x1xf32, #tpu.memory_space<vmem>>, vector<8x1xf32>
    %55 = vector.broadcast %54 : vector<8x1xf32> to vector<8x128xf32>
    %56 = arith.mulf %52, %55 : vector<8x128xf32>
    %cst_12 = arith.constant dense<0.000000e+00> : vector<128xf32>
    %57 = vector.multi_reduction <add>, %56, %cst_12 [0] : vector<8x128xf32> to vector<128xf32>
    %58 = vector.shape_cast %57 : vector<128xf32> to vector<1x128xf32>
    %c0_13 = arith.constant 0 : index
    %c0_14 = arith.constant 0 : index
    %59 = vector.load %arg5[%c0_13, %c0_14] : memref<1x1xf32, #tpu.memory_space<vmem>>, vector<1x1xf32>
    %60 = vector.broadcast %59 : vector<1x1xf32> to vector<1x128xf32>
    %61 = arith.addf %58, %60 : vector<1x128xf32>
    %62 = vector.broadcast %61 : vector<1x128xf32> to vector<8x128xf32>
    %63 = arith.mulf %52, %62 : vector<8x128xf32>
    %64 = arith.addf %63, %53 : vector<8x128xf32>
    %c0_15 = arith.constant 0 : index
    %c0_16 = arith.constant 0 : index
    %65 = vector.load %arg6[%c0_15, %c0_16] : memref<8x1xf32, #tpu.memory_space<vmem>>, vector<8x1xf32>
    %66 = vector.broadcast %65 : vector<8x1xf32> to vector<8x128xf32>
    %67 = arith.addf %64, %66 : vector<8x128xf32>
    %68 = arith.negf %67 : vector<8x128xf32>
    %69 = math.exp %68 : vector<8x128xf32>
    %cst_17 = arith.constant 1.000000e+00 : f32
    %70 = vector.broadcast %cst_17 : f32 to vector<8x128xf32>
    %71 = arith.addf %70, %69 : vector<8x128xf32>
    %72 = arith.divf %70, %71 : vector<8x128xf32>
    %c0_18 = arith.constant 0 : index
    %c0_19 = arith.constant 0 : index
    %73 = vector.load %arg7[%c0_18, %c0_19] : memref<8x128xf32, #tpu.memory_space<vmem>>, vector<8x128xf32>
    tpu.vector_store %arg7[%c0_18, %c0_19], %72 {strides = array<i32>} : memref<8x128xf32, #tpu.memory_space<vmem>>, vector<8x128xf32>,
    return
  }
  func.func @transform_0(%arg0: i32) -> (i32, i32) {
    %c0_i32 = arith.constant 0 : i32
    %c0_i32_0 = arith.constant 0 : i32
    return %c0_i32, %arg0 : i32, i32
  }
  func.func @transform_1(%arg0: i32) -> (i32, i32) {
    %c0_i32 = arith.constant 0 : i32
    %c0_i32_0 = arith.constant 0 : i32
    return %c0_i32, %arg0 : i32, i32
  }
  func.func @transform_2(%arg0: i32) -> (i32, i32) {
    %c0_i32 = arith.constant 0 : i32
    %c0_i32_0 = arith.constant 0 : i32
    %c0_i32_1 = arith.constant 0 : i32
    return %c0_i32, %c0_i32_0 : i32, i32
  }
  func.func @transform_3(%arg0: i32) -> (i32, i32) {
    %c0_i32 = arith.constant 0 : i32
    %c0_i32_0 = arith.constant 0 : i32
    %c0_i32_1 = arith.constant 0 : i32
    return %c0_i32, %c0_i32_0 : i32, i32
  }
  func.func @transform_4(%arg0: i32) -> (i32, i32) {
    %c0_i32 = arith.constant 0 : i32
    %c0_i32_0 = arith.constant 0 : i32
    %c0_i32_1 = arith.constant 0 : i32
    return %c0_i32, %c0_i32_0 : i32, i32
  }
  func.func @transform_5(%arg0: i32) -> (i32, i32) {
    %c0_i32 = arith.constant 0 : i32
    %c0_i32_0 = arith.constant 0 : i32
    %c0_i32_1 = arith.constant 0 : i32
    return %c0_i32, %c0_i32_0 : i32, i32
  }
  func.func @transform_6(%arg0: i32) -> (i32, i32) {
    %c0_i32 = arith.constant 0 : i32
    %c0_i32_0 = arith.constant 0 : i32
    return %c0_i32, %arg0 : i32, i32
  }
}

</mosaic_0001>

<bundles_post_ra>
// kernel: tpu_custom_call.1
= control target key start
LH: loop header
LB: loop body
LE: loop exit
PB: predicated region body
PF: predicated region fallthrough
CT: control target
= control target key end

     0   :  { %s1085_s0 = inlined_call_operand.vmem [shape: f32[4,256], index: 0, kind: input, shape index: {}]   ;;  %s1086_s1 = inlined_call_operand.vmem [shape: s32[1,256], index: 1, kind: input, shape index: {}]   ;;  %s1087_s2 = inlined_call_operand.vmem [shape: f32[16,40], index: 2, kind: input, shape index: {}]   ;;  %s1088_s3 = inlined_call_operand.vmem [shape: f32[8,1], index: 3, kind: input, shape index: {}]   ;;  %s1089_s4 = inlined_call_operand.<no memory space> [shape: f32[1,1], index: 4, kind: input, shape index: {}]   ;;  %s1090_s5 = inlined_call_operand.vmem [shape: f32[8,1], index: 5, kind: input, shape index: {}]   ;;  %s1091_s6 = inlined_call_operand.hbm [shape: f32[8,256], index: 6, kind: output, shape index: {}]  }
   0x1   :  { %v11_v0 = vstv %s1089_s4 }
   0x2   :  { %12 = vst [vmem:[#allocation2] sm:$0x1] %v11_v0 }
   0x3   :  { %13 = vsyncpa [#allocation4], 0 }
   0x4   :  { %15 = vsyncpa [#allocation4 + $0x1], 0  ;;  %s925_s23 = smov 0   ;;  %s927_s24 = smov 0  }
   0x5   :  { %s929_s25 = smov 0   ;;  %s931_s26 = smov 0  }
   0x6 LB: > { %s946_s4 = sadd.s32 4294967295, %s880_s26   ;;  %s707_s27 = sadd.s32 4294967294, %s880_s26   ;;  %s880_s26 = sphi %s931_s26, %s1097_s26   ;;  %s876_s25 = sphi %s929_s25, %s1096_s25   ;;  %s872_s24 = sphi %s927_s24, %s1095_s24   ;;  %s868_s23 = sphi %s925_s23, %s1094_s23  }
   0x7   : > { %s950_s28 = sadd.s32 1, %s880_s26   ;;  %s164_s29 = sadd.s32 1, %s876_s25 }
   0x8   : > { %s161_s30 = ssub.s32 %s880_s26, %s950_s28  ;;  %p174_p0 = scmp.ne.s32.totalorder %s876_s25, %s872_s24 }
   0x9   : > { %p162_p1 = scmp.eq.s32.totalorder %s161_s30, 0  ;;  %p175_p2 = scmp.eq.s32.totalorder %s946_s4, 1 }
   0xa   : > { %p180_p3 = scmp.ne.s32.totalorder %s872_s24, %s868_s23  ;;  %p181_p4 = scmp.eq.s32.totalorder %s707_s27, 1 }
   0xb   : > { %s961_s7 = scalar_select %p162_p1, %s876_s25, %s164_s29  }
   0xc   : > { %p963_p5 = por %p175_p2, %p174_p0  ;;  %p967_p6 = por %p181_p4, %p180_p3 }
   0xd   : > { %p710_p7 = scmp.ge.s32.totalorder %s880_s26, 1  ;;  %p224_p8 = scmp.lt.s32.totalorder %s880_s26, 3 }
   0xf   : > { %p225_p9 = pnand %p710_p7, %p224_p8 }
  0x10   : > { %p256_p10 = scmp.lt.s32.totalorder (!%p225_p9), %s946_s4, 1  ;;  %s713_s10 = sshll.u32 (!%p225_p9), %s946_s4, 3  ;;  %v268_v1 = vlaneseq (!%p225_p9)  ;;  %v882_v2 = vmov (!%p225_p9), 0.0   ;;  %vm883_vm0 = vmmov (!%p225_p9), 0   ;;  %vm277_vm1 = vcmask (!%p225_p9), 1043456   ;;  %v501_v19 = vld [vmem:[%s1087_s2] sm:$0xff] (!%p225_p9) }
  0x11   : > { %228 = sbr.rel (%p225_p9) target bundleno = 773 (0x305), region = 44  ;;  %736 = vmatprep.subr.mxu0 (!%p225_p9), %v882_v2  ;;  %738 = vmatprep.mubr.msk.f32.mxu0 (!%p225_p9), %vm883_vm0, %v882_v2  ;;  %v266_v4 = vstv (!%p225_p9), %s713_s10  ;;  %v884_v10 = vmov (!%p225_p9), 1.0   ;;  %vm357_vm3 = vcmask (!%p225_p9), 64512   ;;  %vm503_vm4 = vcmask (!%p225_p9), 326656   ;;  %v585_v20 = vld [vmem:[%s1088_s3] sm:$0xff] (!%p225_p9)  ;;  %v502_v62 = vld [vmem:[%s1087_s2 + $0x8] sm:$0xff] (!%p225_p9) }
  0x12   : > { %v977_v3 = vshrl.u32 (!%p225_p9), %v268_v1, 7  ;;  %756 = vmatprep.mubr.msk.f32.mxu1 (!%p225_p9), %vm503_vm4, %v501_v19  ;;  %v611_v21 = vld [vmem:[%s1090_s5] sm:$0xff] (!%p225_p9)  ;;  %v885_v22 = vmov (!%p225_p9), 0   ;;  %s722_s13 = sshll.u32 (!%p225_p9), %s946_s4, 7 }
  0x13   : > { %810 = vset.pattern.permute.xlu0 (!%p225_p9), %v885_v22  ;;  %811 = vset.pattern.permute.xlu1 (!%p225_p9), %v885_v22  ;;  %v598_v23 = vld [vmem:[#allocation2] sm:$0x1] (!%p225_p9) }
  0x14   : > { %v983_v5 = vsub.s32 (!%p225_p9), 0, %v977_v3  ;;  %v354_v15 = vsub.s32 (!%p225_p9), 4, %v977_v3  ;;  %588 = vperm.xlu0 (!%p225_p9), %810, %v585_v20   ;;  %614 = vperm.xlu1 (!%p225_p9), %811, %v611_v21   ;;  %v439_v24 = vsub.s32 (!%p225_p9), 1, %v977_v3  ;;  %v449_v25 = vsub.s32 (!%p225_p9), 3, %v977_v3 }
  0x15   : > { %v444_v28 = vsub.s32 (!%p225_p9), 2, %v977_v3 }
  0x18   : > { %s257_s11 = scalar_select %p256_p10, %s946_s4, 1  ;;  %601 = vperm.xlu0 %810, %v598_v23  }
  0x19   : > { %s886_s4 = smov [#allocation3]  }
  0x1a   : > { %s712_s12 = sshll.u32 %s257_s11, 2  ;;  %s262_s15 = scalar_lea.vmem %s1086_s1, %s257_s11 }
  0x1b   : > { %s259_s18 = scalar_lea.vmem %s1085_s0, %s712_s12  ;;  %v264_v6 = vld [vmem:[%s262_s15] sm:$0x1]  ;;  %s253_s11 = sand.u32 1, %s872_s24  }
  0x1c   : > { %v267_v7 = vsub.s32 %v264_v6, %v266_v4  ;;  %v988_v8 = vld [vmem:[%s259_s18] sm:$0xf]  ;;  %s711_s12 = sshll.u32 %s253_s11, 3  ;;  %s1043_s18 = scalar_lea.hbm %s1091_s6, %s722_s13 }
  0x1d   : > { %v278_v11 = vsel %vm277_vm1, %v988_v8, 1.0  ;;  %v468_v26 = vrot.slane %v988_v8, %v439_v24  ;;  %v478_v27 = vrot.slane %v988_v8, %v449_v25  ;;  %v473_v30 = vrot.slane %v988_v8, %v444_v28  ;;  %s255_s14 = scalar_lea.vmem [#allocation3], %s711_s12  ;;  %s626_s19 = scalar_lea.sflag [#allocation4], %s253_s11 }
  0x1e   : > { %v273_v9 = vrot.slane %v267_v7, %v983_v5  ;;  %v463_v32 = vrot.slane %v988_v8, %v983_v5  ;;  %v497_v60 = vrot.slane %v988_v8, 4  ;;  %s639_s15 = sshll.u32 %s255_s14, 4  ;;  %s822_s21 = sshll.u32 %s886_s4, 4  ;;  %s1045_s15 = int_to_ptr.vmem [resolvable:$true] %s639_s15  ;;  %s823_s21 = int_to_ptr.vmem [resolvable:$false] %s822_s21 }
  0x1f   : > { %v469_v29 = vmul.f32 %v468_v26, %v988_v8  ;;  %v479_v31 = vmul.f32 %v478_v27, %v988_v8  ;;  %v474_v34 = vmul.f32 %v473_v30, %v988_v8  ;;  %s818_s20 = scalar_lea.vmem %s1045_s15, 128  ;;  %s824_s22 = scalar_lea.vmem %s823_s21, 256 }
  0x20   : > { %vm274_vm2 = vcmp.eq.s32.totalorder %v273_v9, %v977_v3  ;;  %v464_v33 = vmul.f32 %v463_v32, %v988_v8  ;;  %p819_p11 = scmp.ne.s32.totalorder %s1045_s15, %s818_s20  ;;  %p825_p0 = scmp.lt.s32.totalorder %s1045_s15, %s823_s21 }
  0x21   : > { %737 = vmatpush3.xpose.msk.msra.mxu0 %vm274_vm2, %v884_v10  ;;  %v481_v35 = vrot.slane %v469_v29, 4  ;;  %v484_v36 = vrot.slane %v479_v31, 4  ;;  %p826_p1 = scmp.lt.s32.totalorder %s824_s22, %s818_s20 }
  0x22   : > { %741 = vmatprep.subr.mxu0 %v882_v2  ;;  %p820_p12 = pnand %p819_p11, %p963_p5 }
  0x23   : > { %v486_v37 = vsel %vm277_vm1, %v464_v33, %v481_v35  ;;  %v487_v38 = vsel %vm277_vm1, %v474_v34, %v484_v36  ;;  %p827_p2 = por %p826_p1, %p825_p0 }
  0x24   : > { %739 = vmatmul.mubr.f32.vlgmr.msra.gmra.mrb[0].mxu0 %v278_v11  ;;  %v490_v42 = vrot.slane %v486_v37, 4  ;;  %v491_v43 = vrot.slane %v487_v38, 4  ;;  %p821_p13 = pneg %p820_p12 }
  0x25   : > { %742 = vmatpush3.msk.msra.mxu0 %vm274_vm2, %v884_v10  ;;  %743 = vmatprep.mubr.msk.f32.mxu0 %vm883_vm0, %v882_v2 }
  0x26   : > { %v492_v50 = vsel %vm277_vm1, %v490_v42, %v491_v43  ;;  %v499_v51 = vsel %vm277_vm1, %v988_v8, %v490_v42  ;;  %v500_v61 = vsel %vm277_vm1, %v491_v43, %v497_v60  ;;  %p828_p3 = pnand %p827_p2, %p821_p13 }
  0x27   : > { %v763_v59 = vpack.c.bf16 %v492_v50, %v499_v51 }
  0x93   : > { %v589_v0 = vpop.permute.xlu0 %588 }
  0xf7   : > { %v345_v12 = vpop.f32.mrb[0].mxu0 }
  0xf8   : > { %v349_v13 = vmax.f32 %v345_v12, 1.0  ;;  %v740_v14 = vpop.f32.mrb[1].mxu0 }
  0xf9   : > { %v615_v14 = vpop.permute.xlu1 %614 }
  0xfa   : > { %812 = vrcp.f32 %v349_v13 }
 0x104   : > { %v813_v16 = vpop.eup %812 }
 0x105   : > { %v355_v17 = vrot.slane %v813_v16, %v354_v15 }
 0x107   : > { %v356_v18 = vmul.f32 %v355_v17, %v345_v12 }
 0x109   : > { %744 = vmatmul.mubr.msk.f32.vlgmr.msra.gmra.mrb[2].mxu0 %vm357_vm3, %v356_v18 }
 0x1dc   : > { %v427_v39 = vpop.f32.mrb[2].mxu0 }
 0x1dd   : > { %v431_v40 = vsub.f32 %v427_v39, %v988_v8  ;;  %v745_v41 = vpop.f32.mrb[3].mxu0 }
 0x1df   : > { %v435_v44 = vrot.slane %v431_v40, %v983_v5  ;;  %v440_v45 = vrot.slane %v431_v40, %v439_v24  ;;  %v445_v46 = vrot.slane %v431_v40, %v444_v28  ;;  %v450_v47 = vrot.slane %v431_v40, %v449_v25 }
 0x1e1   : > { %v441_v48 = vmul.f32 %v440_v45, %v988_v8  ;;  %v451_v49 = vmul.f32 %v450_v47, %v988_v8  ;;  %v436_v52 = vmul.f32 %v435_v44, %v988_v8  ;;  %v446_v53 = vmul.f32 %v445_v46, %v988_v8  ;;  %v602_v8 = vpop.permute.xlu0 %601 }
 0x1e2   : > { %v607_v10 = vrot.slane %v602_v8, %v983_v5 }
 0x1e3   : > { %v453_v54 = vrot.slane %v441_v48, 4  ;;  %v456_v55 = vrot.slane %v451_v49, 4 }
 0x1e5   : > { %v458_v56 = vsel %vm277_vm1, %v436_v52, %v453_v54  ;;  %v459_v57 = vsel %vm277_vm1, %v446_v53, %v456_v55 }
 0x1e6   : > { %v759_v58 = vpack.c.bf16 %v459_v57, %v458_v56 }
 0x1e8   : > { %760 = vmatprep.subr.bf16.mxu1 %v759_v58 }
 0x1e9   : > { %762 = vmatpush3.bf16.msra.mxu1 %v759_v58 }
 0x1ea   : > { %764 = vmatprep.subr.bf16.mxu1 %v763_v59 }
 0x1ed   : > { %766 = vmatpush3.bf16.msra.mxu1 %v763_v59 }
 0x1ee   : > { %754 = vmatprep.subr.mxu1 %v500_v61 }
 0x1f1   : > { %755 = vmatpush3.msra.mxu1 %v500_v61 }
 0x1f2   : > { %757 = vmatmul.mubr.msk.f32.vlgmr.msra.gmra.mrb[0].mxu1 %vm503_vm4, %v502_v62 }
 0x2c5   : > { %v758_v63 = vpop.f32.mrb[0].mxu1 }
 0x2c6   : > { %v576_v1 = vpop.f32.mrb[1].mxu1 }
 0x2c7   : > { %v591_v2 = vmul.f32 %v589_v0, %v576_v1 }
 0x2c9   : > { %v592_v3 = vrot.slane %v591_v2, 4 }
 0x2cb   : > { %v593_v4 = vadd.f32 %v592_v3, %v591_v2 }
 0x2cd   : > { %v594_v6 = vrot.slane %v593_v4, 2 }
 0x2cf   : > { %v595_v7 = vadd.f32 %v594_v6, %v593_v4 }
 0x2d1   : > { %v596_v9 = vrot.slane %v595_v7, 1 }
 0x2d3   : > { %v597_v11 = vadd.f32 %v596_v9, %v595_v7 }
 0x2d5   : > { %v608_v12 = vadd.f32 %v607_v10, %v597_v11 }
 0x2d7   : > { %v609_v13 = vmul.f32 %v608_v12, %v576_v1 }
 0x2d9   : > { %v610_v15 = vadd.f32 %v758_v63, %v609_v13 }
 0x2db   : > { %v617_v16 = vadd.f32 %v615_v14, %v610_v15 }
 0x2dd   : > { %v720_v17 = vmul.f32 -1.442695, %v617_v16 }
 0x2df   : > { %814 = vpow2.f32 %v720_v17 }
 0x2e9   : > { %v815_v18 = vpop.eup %814 }
 0x2ea   : > { %v621_v19 = vadd.f32 1.0, %v815_v18 }
 0x2ec   : > { %816 = vrcp.f32 %v621_v19 }
 0x2f6   : > { %v817_v5 = vpop.eup %816 }
 0x2f7   : > { %624 = vst [vmem:[%s255_s14] sm:$0xff] %v817_v5 }
 0x2f8   : > { %831 = shalt.err (!%p828_p3)
}
 0x2f9   : > { %s832_s27 = scalar_lea.hbm %s1043_s18, 128  ;;  %s836_s10 = scalar_lea.hbm %s1091_s6, 256 }
 0x2fa   : > { %p833_p4 = scmp.ne.s32.totalorder %s1043_s18, %s832_s27  ;;  %p837_p9 = scmp.lt.u32.totalorder %s1043_s18, %s1091_s6 }
 0x2fb   : > { %p838_p10 = scmp.lt.u32.totalorder %s836_s10, %s832_s27  ;;  %p840_p12 = scmp.lt.u32.totalorder %s832_s27, %s1043_s18 }
 0x2fc   : > { %p834_p7 = pnand %p833_p4, %p963_p5 }
 0x2fd   : > { %p839_p11 = por %p838_p10, %p837_p9 }
 0x2fe   : > { %p835_p8 = pneg %p834_p7 }
 0x2ff   : > { %p841_p13 = por %p840_p12, %p839_p11 }
 0x301   : > { %p842_p0 = pnand %p841_p13, %p835_p8 }
 0x303   : > { %845 = shalt.err (!%p842_p0)
}
 0x304   : > { %767 = dma.vmem_to_hbm [thread:$0]  (%p963_p5), %s1045_s15, 128, %s1043_s18, %s626_s19  }
 0x305 PF: > { %p773_p1 = scmp.ge.s32.totalorder %s880_s26, 2  ;;  %s651_s13 = sand.u32 1, %s868_s23  }
 0x306   : > { %s652_s14 = scalar_lea.sflag [#allocation4], %s651_s13 }
 0x307   : > { %p770_p2 = pnand %p773_p1, %p967_p6 }
 0x309   : > { %863 = dma.done.wait (!%p770_p2), %s652_s14, 128  }
 0x30a   : > { %865 = vsyncadd (!%p770_p2), %s652_s14, 4294967168  ;;  %p18_p3 = scmp.ge.s32.totalorder %s950_s28, 4   ;;  %s1094_s23 = smov %s872_s24 }
 0x30b   : > { %s1095_s24 = smov %s876_s25  ;;  %s1096_s25 = smov %s961_s7 }
 0x30c   : > { %s1097_s26 = smov %s950_s28  ;;  %20 = sbr.rel (!%p18_p3) target bundleno = 6 (0x6), region = 82 }
 0x313   :  { %657 = vsyncpa [#allocation4], 1 }
 0x314   :  { %659 = vsyncpa [#allocation4 + $0x1], 1 }

</bundles_post_ra>
